<compile_context>
chip_gen: v7x
topology: tpu7x:2x2x1
jax: 0.10.0
libtpu: 0.0.40
codegen_flags: <defaults>
</compile_context>

<pallas_src>
import numpy as np
import jax
import jax.numpy as jnp
from jax import lax
from jax.experimental import pallas as pl
from jax.experimental.pallas import tpu as pltpu

C_IN = 9        # input_channels
C1 = 32         # conv1 out channels
C2 = 64         # conv2 out channels
K = 8           # conv kernel size
P = 4           # conv padding
OUT_DIM = 64    # projection output dim


def _round_up(n, m):
    return ((n + m - 1) // m) * m


def _sizes(L):
    Lc1 = L + 2 * P - K + 1          # conv1 output length
    Lp1 = (Lc1 - 2) // 2 + 1         # maxpool1 output length (floor mode)
    Lc2 = Lp1 + 2 * P - K + 1        # conv2 output length
    Lp2 = (Lc2 - 2) // 2 + 1         # maxpool2 output length
    return Lc1, Lp1, Lc2, Lp2


def _pick_batch_tile(B, L):
    """Largest VMEM-safe batch tile, preferring >= 2 grid steps (v7x 2-TC sharding)."""
    _, Lp1, Lc2, _ = _sizes(L)
    Lh = _round_up(Lp1, 8)
    Lc2p = _round_up(Lc2, 16)
    per_sample = (2 * (2 * Lh) * (K * C_IN) * 2    # im1 tile (bf16, double-buffered)
                  + (2 * Lh) * C1 * 4              # a1 (f32)
                  + (Lc2p + K) * C1 * 2            # padded conv2 input (bf16)
                  + Lc2p * (K * C1) * 2            # im2 (bf16)
                  + Lc2p * C2 * 4                  # a2 (f32)
                  + 2 * 2 * C2 * 4)                # packed output (double-buffered)
    budget = 6 * 1024 * 1024                       # well under every scoped-VMEM default
    cands = [tb for tb in (128, 64, 32, 16, 8)
             if B % tb == 0 and tb * per_sample <= budget]
    for tb in cands:                               # prefer grid length >= 2 (v7x)
        if B // tb >= 2:
            return tb
    if cands:
        return cands[0]
    return B                                       # tiny/odd batch: single grid step


def simclr_forward(x, params, batch_tile=None):
    """x: (B, L, C_IN) float32 (same layout the PyTorch module receives).
    Returns (h, z), each (B, 64) float32."""
    w1, b1, w2, b2, pw1, pb1, pw2, pb2 = params
    B, L, _ = x.shape
    Lc1, Lp1, Lc2, Lp2 = _sizes(L)
    Lh = _round_up(Lp1, 8)           # rows per parity half (sublane-tile aligned)
    Lc2p = _round_up(Lc2, 16)        # conv2 rows padded so flatten/unflatten are views
    back = Lc2p + K - 1 - P - Lp1    # trailing zero rows of the padded conv2 input

    TB = batch_tile if batch_tile is not None else _pick_batch_tile(B, L)
    assert B % TB == 0, "batch must be divisible by the batch tile"

    # ---- conv1 im2col hoisted to the wrapper (plain XLA), parity-split + bf16 ----
    xp = jnp.pad(x, ((0, 0), (P, P), (0, 0)))                              # (B, L+2P, 9)
    cols = jnp.concatenate([xp[:, k:k + Lc1, :] for k in range(K)], axis=-1)  # (B, Lc1, 72)
    even = cols[:, 0:2 * Lp1:2, :]                                         # conv rows 2j
    odd = cols[:, 1:2 * Lp1:2, :]                                          # conv rows 2j+1
    if Lh > Lp1:
        pad = ((0, 0), (0, Lh - Lp1), (0, 0))
        even = jnp.pad(even, pad)
        odd = jnp.pad(odd, pad)
    im1 = jnp.concatenate([even, odd], axis=1).astype(jnp.bfloat16)        # (B, 2*Lh, 72)

    # im2col weight layouts, bf16 matmul operands (accumulation stays f32 in-kernel)
    w1f = w1.reshape(K * C_IN, C1).astype(jnp.bfloat16)                    # (72, 32)
    w2f = w2.reshape(K * C1, C2).astype(jnp.bfloat16)                      # (256, 64)
    pw1b = pw1.astype(jnp.bfloat16)
    pw2b = pw2.astype(jnp.bfloat16)

    def kernel(im1_ref, w1_ref, b1_ref, w2_ref, b2_ref,
               pw1_ref, pb1_ref, pw2_ref, pb2_ref, out_ref):
        # ---- Conv1: one (TB*2*Lh, 72) x (72, 32) matmul (reshape is a pure view) ----
        a1 = jnp.dot(im1_ref[...].reshape(TB * 2 * Lh, K * C_IN), w1_ref[...],
                     preferred_element_type=jnp.float32)
        a1 = jnp.maximum(a1 + b1_ref[...], 0.0).reshape(TB, 2 * Lh, C1)

        # ---- MaxPool1d(2,2): halves hold even/odd conv1 rows -> one vector maximum ----
        pool1 = jnp.maximum(a1[:, :Lh, :], a1[:, Lh:, :])[:, :Lp1, :]      # (TB, Lp1, 32)

        # ---- padded conv2 input: single 3-piece concatenate, bf16 ----
        zf = jnp.zeros((TB, P, C1), jnp.bfloat16)
        zb = jnp.zeros((TB, back, C1), jnp.bfloat16)
        xp2 = jnp.concatenate([zf, pool1.astype(jnp.bfloat16), zb], axis=1)

        # ---- Conv2: in-kernel im2col -> one (TB*Lc2p, 256) x (256, 64) matmul ----
        im2 = jnp.concatenate([xp2[:, k:k + Lc2p, :] for k in range(K)], axis=-1)
        a2 = jnp.dot(im2.reshape(TB * Lc2p, K * C1), w2_ref[...],
                     preferred_element_type=jnp.float32)
        a2 = jnp.maximum(a2 + b2_ref[...], 0.0).reshape(TB, Lc2p, C2)

        # ---- MaxPool1d(2,2) + AdaptiveAvgPool1d(1): adjacent-row maximum, then a
        #      masked sublane-axis sum (even, in-range rows only) ----
        m2 = jnp.maximum(a2[:, :Lc2p - 1, :], a2[:, 1:, :])                # (TB, Lc2p-1, 64)
        ridx = lax.broadcasted_iota(jnp.int32, m2.shape, 1)
        keep = (ridx % 2 == 0) & (ridx < 2 * Lp2)
        h = jnp.sum(jnp.where(keep, m2, 0.0), axis=1) * (1.0 / Lp2)        # (TB, 64)

        # ---- projection MLP: Linear -> ReLU -> Linear ----
        z1 = jnp.maximum(jnp.dot(h.astype(jnp.bfloat16), pw1_ref[...],
                                 preferred_element_type=jnp.float32) + pb1_ref[...], 0.0)
        z = jnp.dot(z1.astype(jnp.bfloat16), pw2_ref[...],
                    preferred_element_type=jnp.float32) + pb2_ref[...]

        # lane-dense packed output: cols [0:64] = h, [64:128] = z
        out_ref[...] = jnp.concatenate([h, z], axis=-1)

    def full(shape):
        return pl.BlockSpec(shape, lambda i: (0,) * len(shape))

    packed = pl.pallas_call(
        kernel,
        out_shape=jax.ShapeDtypeStruct((B, 2 * C2), jnp.float32),
        grid=(B // TB,),
        in_specs=[
            pl.BlockSpec((TB, 2 * Lh, K * C_IN), lambda i: (i, 0, 0)),  # im1: batch-tiled
            full((K * C_IN, C1)), full((1, C1)),                        # conv1 weight / bias
            full((K * C1, C2)), full((1, C2)),                          # conv2 weight / bias
            full((C2, OUT_DIM)), full((1, OUT_DIM)),                    # proj linear 1
            full((OUT_DIM, OUT_DIM)), full((1, OUT_DIM)),               # proj linear 2
        ],
        out_specs=pl.BlockSpec((TB, 2 * C2), lambda i: (i, 0)),
        compiler_params=pltpu.CompilerParams(
            dimension_semantics=("parallel",)),
    )(im1, w1f, b1, w2f, b2, pw1b, pb1, pw2b, pb2)

    return packed[:, :C2], packed[:, C2:]


def ref_forward(x, params):
    """Pure-JAX reference mirroring the PyTorch module (all-f32, for verification)."""
    w1, b1, w2, b2, pw1, pb1, pw2, pb2 = params
    w1_oik = jnp.transpose(w1, (2, 1, 0))        # back to (Cout, Cin, K)
    w2_oik = jnp.transpose(w2, (2, 1, 0))
    xc = jnp.transpose(x, (0, 2, 1))             # (B, C, L) like x.permute(0,2,1)
    y = lax.conv_general_dilated(xc, w1_oik, (1,), [(P, P)],
                                 dimension_numbers=('NCH', 'OIH', 'NCH'))
    y = jnp.maximum(y + b1.reshape(1, C1, 1), 0.0)
    y = lax.reduce_window(y, -jnp.inf, lax.max, (1, 1, 2), (1, 1, 2), 'VALID')
    y = lax.conv_general_dilated(y, w2_oik, (1,), [(P, P)],
                                 dimension_numbers=('NCH', 'OIH', 'NCH'))
    y = jnp.maximum(y + b2.reshape(1, C2, 1), 0.0)
    y = lax.reduce_window(y, -jnp.inf, lax.max, (1, 1, 2), (1, 1, 2), 'VALID')
    h = jnp.mean(y, axis=2)
    z1 = jnp.maximum(h @ pw1 + pb1, 0.0)
    z = z1 @ pw2 + pb2
    return h, z


if __name__ == "__main__":
    B, L = 2, 16
    key = jax.random.PRNGKey(0)
    ks = jax.random.split(key, 9)
    x = jax.random.normal(ks[0], (B, L, C_IN), jnp.float32)

    # deterministic synthetic parameters (pre-transposed into kernel layout)
    w1 = 0.1 * jax.random.normal(ks[1], (K, C_IN, C1), jnp.float32)   # conv1 weight (K,Cin,Cout)
    b1 = 0.1 * jax.random.normal(ks[2], (1, C1), jnp.float32)
    w2 = 0.1 * jax.random.normal(ks[3], (K, C1, C2), jnp.float32)     # conv2 weight (K,Cin,Cout)
    b2 = 0.1 * jax.random.normal(ks[4], (1, C2), jnp.float32)
    pw1 = 0.1 * jax.random.normal(ks[5], (C2, OUT_DIM), jnp.float32)  # Linear1 (in,out)
    pb1 = 0.1 * jax.random.normal(ks[6], (1, OUT_DIM), jnp.float32)
    pw2 = 0.1 * jax.random.normal(ks[7], (OUT_DIM, OUT_DIM), jnp.float32)
    pb2 = 0.1 * jax.random.normal(ks[8], (1, OUT_DIM), jnp.float32)
    params = (w1, b1, w2, b2, pw1, pb1, pw2, pb2)

    h, z = jax.jit(simclr_forward)(x, params)
    jax.block_until_ready((h, z))

    h_ref, z_ref = ref_forward(x, params)
    # Matmul inputs are bf16 in the kernel (f32 accumulation), so keep a loose
    # tolerance against the all-f32 reference.
    np.testing.assert_allclose(np.asarray(h), np.asarray(h_ref), rtol=5e-2, atol=5e-2)
    np.testing.assert_allclose(np.asarray(z), np.asarray(z_ref), rtol=5e-2, atol=5e-2)
    print("KERNEL_OK")
</pallas_src>

<mosaic_0001>
module attributes {stable_mosaic.version = 11 : i64} {
  func.func @kernel(%arg0: i32, %arg1: memref<2x16x72xbf16, #tpu.memory_space<vmem>>, %arg2: memref<72x32xbf16, #tpu.memory_space<vmem>>, %arg3: memref<1x32xf32, #tpu.memory_space<vmem>>, %arg4: memref<256x64xbf16, #tpu.memory_space<vmem>>, %arg5: memref<1x64xf32, #tpu.memory_space<vmem>>, %arg6: memref<64x64xbf16, #tpu.memory_space<vmem>>, %arg7: memref<1x64xf32, #tpu.memory_space<vmem>>, %arg8: memref<64x64xbf16, #tpu.memory_space<vmem>>, %arg9: memref<1x64xf32, #tpu.memory_space<vmem>>, %arg10: memref<2x128xf32, #tpu.memory_space<vmem>>) attributes {dimension_semantics = [#tpu.dimension_semantics<parallel>], iteration_bounds = array<i64: 1>, scalar_prefetch = 0 : i64, scratch_operands = 0 : i64, tpu.core_type = #tpu.core_type<tc>, window_params = [{transform_indices = @transform_0, window_bounds = array<i64: 2, 16, 72>}, {pipeline_mode = #tpu.pipeline_mode<synchronous>, transform_indices = @transform_1, window_bounds = array<i64: 72, 32>}, {pipeline_mode = #tpu.pipeline_mode<synchronous>, transform_indices = @transform_2, window_bounds = array<i64: 1, 32>}, {pipeline_mode = #tpu.pipeline_mode<synchronous>, transform_indices = @transform_3, window_bounds = array<i64: 256, 64>}, {pipeline_mode = #tpu.pipeline_mode<synchronous>, transform_indices = @transform_4, window_bounds = array<i64: 1, 64>}, {pipeline_mode = #tpu.pipeline_mode<synchronous>, transform_indices = @transform_5, window_bounds = array<i64: 64, 64>}, {pipeline_mode = #tpu.pipeline_mode<synchronous>, transform_indices = @transform_6, window_bounds = array<i64: 1, 64>}, {pipeline_mode = #tpu.pipeline_mode<synchronous>, transform_indices = @transform_7, window_bounds = array<i64: 64, 64>}, {pipeline_mode = #tpu.pipeline_mode<synchronous>, transform_indices = @transform_8, window_bounds = array<i64: 1, 64>}, {transform_indices = @transform_9, window_bounds = array<i64: 2, 128>}]} {
    %c0 = arith.constant 0 : index
    %c0_0 = arith.constant 0 : index
    %c0_1 = arith.constant 0 : index
    %0 = vector.load %arg1[%c0, %c0_0, %c0_1] : memref<2x16x72xbf16, #tpu.memory_space<vmem>>, vector<2x16x72xbf16>
    %1 = vector.shape_cast %0 : vector<2x16x72xbf16> to vector<32x72xbf16>
    %c0_2 = arith.constant 0 : index
    %c0_3 = arith.constant 0 : index
    %2 = vector.load %arg2[%c0_2, %c0_3] : memref<72x32xbf16, #tpu.memory_space<vmem>>, vector<72x32xbf16>
    %cst = arith.constant dense<0.000000e+00> : vector<32x32xf32>
    %3 = tpu.matmul %1, %2, %cst {dimension_numbers = #tpu.dot_dimension_numbers<[1], [0], [0], [1], [0, 0, 1, 1], [], []>} : vector<32x72xbf16>, vector<72x32xbf16>, vector<32x32xf32> -> vector<32x32xf32>
    %c0_4 = arith.constant 0 : index
    %c0_5 = arith.constant 0 : index
    %4 = vector.load %arg3[%c0_4, %c0_5] : memref<1x32xf32, #tpu.memory_space<vmem>>, vector<1x32xf32>
    %5 = vector.broadcast %4 : vector<1x32xf32> to vector<32x32xf32>
    %6 = arith.addf %3, %5 : vector<32x32xf32>
    %cst_6 = arith.constant 0.000000e+00 : f32
    %7 = vector.broadcast %cst_6 : f32 to vector<32x32xf32>
    %8 = arith.maximumf %6, %7 : vector<32x32xf32>
    %9 = vector.shape_cast %8 : vector<32x32xf32> to vector<2x16x32xf32>
    %10 = vector.extract_strided_slice %9 {offsets = [0, 0, 0], sizes = [2, 8, 32], strides = [1, 1, 1]} : vector<2x16x32xf32> to vector<2x8x32xf32>
    %11 = vector.extract_strided_slice %9 {offsets = [0, 8, 0], sizes = [2, 8, 32], strides = [1, 1, 1]} : vector<2x16x32xf32> to vector<2x8x32xf32>
    %12 = arith.maximumf %10, %11 : vector<2x8x32xf32>
    %cst_7 = arith.constant 0.000000e+00 : bf16
    %13 = vector.broadcast %cst_7 : bf16 to vector<2x4x32xbf16>
    %cst_8 = arith.constant 0.000000e+00 : bf16
    %14 = vector.broadcast %cst_8 : bf16 to vector<2x11x32xbf16>
    %15 = arith.truncf %12 : vector<2x8x32xf32> to vector<2x8x32xbf16>
    %16 = tpu.concatenate %13, %15, %14 in 1 : vector<2x4x32xbf16>, vector<2x8x32xbf16>, vector<2x11x32xbf16> -> vector<2x23x32xbf16>
    %17 = vector.extract_strided_slice %16 {offsets = [0, 0, 0], sizes = [2, 16, 32], strides = [1, 1, 1]} : vector<2x23x32xbf16> to vector<2x16x32xbf16>
    %18 = vector.extract_strided_slice %16 {offsets = [0, 1, 0], sizes = [2, 16, 32], strides = [1, 1, 1]} : vector<2x23x32xbf16> to vector<2x16x32xbf16>
    %19 = vector.extract_strided_slice %16 {offsets = [0, 2, 0], sizes = [2, 16, 32], strides = [1, 1, 1]} : vector<2x23x32xbf16> to vector<2x16x32xbf16>
    %20 = vector.extract_strided_slice %16 {offsets = [0, 3, 0], sizes = [2, 16, 32], strides = [1, 1, 1]} : vector<2x23x32xbf16> to vector<2x16x32xbf16>
    %21 = vector.extract_strided_slice %16 {offsets = [0, 4, 0], sizes = [2, 16, 32], strides = [1, 1, 1]} : vector<2x23x32xbf16> to vector<2x16x32xbf16>
    %22 = vector.extract_strided_slice %16 {offsets = [0, 5, 0], sizes = [2, 16, 32], strides = [1, 1, 1]} : vector<2x23x32xbf16> to vector<2x16x32xbf16>
    %23 = vector.extract_strided_slice %16 {offsets = [0, 6, 0], sizes = [2, 16, 32], strides = [1, 1, 1]} : vector<2x23x32xbf16> to vector<2x16x32xbf16>
    %24 = vector.extract_strided_slice %16 {offsets = [0, 7, 0], sizes = [2, 16, 32], strides = [1, 1, 1]} : vector<2x23x32xbf16> to vector<2x16x32xbf16>
    %25 = tpu.concatenate %17, %18, %19, %20, %21, %22, %23, %24 in 2 : vector<2x16x32xbf16>, vector<2x16x32xbf16>, vector<2x16x32xbf16>, vector<2x16x32xbf16>, vector<2x16x32xbf16>, vector<2x16x32xbf16>, vector<2x16x32xbf16>, vector<2x16x32xbf16> -> vector<2x16x256xbf16>
    %26 = vector.shape_cast %25 : vector<2x16x256xbf16> to vector<32x256xbf16>
    %c0_9 = arith.constant 0 : index
    %c0_10 = arith.constant 0 : index
    %27 = vector.load %arg4[%c0_9, %c0_10] : memref<256x64xbf16, #tpu.memory_space<vmem>>, vector<256x64xbf16>
    %cst_11 = arith.constant dense<0.000000e+00> : vector<32x64xf32>
    %28 = tpu.matmul %26, %27, %cst_11 {dimension_numbers = #tpu.dot_dimension_numbers<[1], [0], [0], [1], [0, 0, 1, 1], [], []>} : vector<32x256xbf16>, vector<256x64xbf16>, vector<32x64xf32> -> vector<32x64xf32>
    %c0_12 = arith.constant 0 : index
    %c0_13 = arith.constant 0 : index
    %29 = vector.load %arg5[%c0_12, %c0_13] : memref<1x64xf32, #tpu.memory_space<vmem>>, vector<1x64xf32>
    %30 = vector.broadcast %29 : vector<1x64xf32> to vector<32x64xf32>
    %31 = arith.addf %28, %30 : vector<32x64xf32>
    %cst_14 = arith.constant 0.000000e+00 : f32
    %32 = vector.broadcast %cst_14 : f32 to vector<32x64xf32>
    %33 = arith.maximumf %31, %32 : vector<32x64xf32>
    %34 = vector.shape_cast %33 : vector<32x64xf32> to vector<2x16x64xf32>
    %35 = vector.extract_strided_slice %34 {offsets = [0, 0, 0], sizes = [2, 15, 64], strides = [1, 1, 1]} : vector<2x16x64xf32> to vector<2x15x64xf32>
    %36 = vector.extract_strided_slice %34 {offsets = [0, 1, 0], sizes = [2, 15, 64], strides = [1, 1, 1]} : vector<2x16x64xf32> to vector<2x15x64xf32>
    %37 = arith.maximumf %35, %36 : vector<2x15x64xf32>
    %38 = tpu.iota {dimensions = array<i32: 1>} : vector<2x15x64xi32>
    %c2_i32 = arith.constant 2 : i32
    %c0_i32 = arith.constant 0 : i32
    %39 = arith.cmpi eq, %c2_i32, %c0_i32 : i32
    %c1_i32 = arith.constant 1 : i32
    %40 = arith.select %39, %c1_i32, %c2_i32 : i32
    %41 = vector.broadcast %40 : i32 to vector<2x15x64xi32>
    %42 = arith.remsi %38, %41 : vector<2x15x64xi32>
    %c0_i32_15 = arith.constant 0 : i32
    %43 = vector.broadcast %c0_i32_15 : i32 to vector<2x15x64xi32>
    %44 = arith.cmpi ne, %42, %43 : vector<2x15x64xi32>
    %c0_i32_16 = arith.constant 0 : i32
    %45 = vector.broadcast %c0_i32_16 : i32 to vector<2x15x64xi32>
    %46 = arith.cmpi slt, %42, %45 : vector<2x15x64xi32>
    %c0_i32_17 = arith.constant 0 : i32
    %47 = arith.cmpi slt, %40, %c0_i32_17 : i32
    %48 = vector.broadcast %47 : i1 to vector<2x15x64xi1>
    %49 = vector.broadcast %48 : vector<2x15x64xi1> to vector<2x15x64xi1>
    %50 = arith.xori %46, %49 : vector<2x15x64xi1>
    %51 = arith.andi %50, %44 : vector<2x15x64xi1>
    %52 = vector.broadcast %40 : i32 to vector<2x15x64xi32>
    %53 = arith.addi %42, %52 : vector<2x15x64xi32>
    %54 = arith.select %51, %53, %42 : vector<2x15x64xi1>, vector<2x15x64xi32>
    %c0_i32_18 = arith.constant 0 : i32
    %55 = vector.broadcast %c0_i32_18 : i32 to vector<2x15x64xi32>
    %56 = arith.cmpi eq, %54, %55 : vector<2x15x64xi32>
    %c8_i32 = arith.constant 8 : i32
    %57 = vector.broadcast %c8_i32 : i32 to vector<2x15x64xi32>
    %58 = arith.cmpi slt, %38, %57 : vector<2x15x64xi32>
    %59 = arith.andi %56, %58 : vector<2x15x64xi1>
    %cst_19 = arith.constant 0.000000e+00 : f32
    %60 = vector.broadcast %cst_19 : f32 to vector<2x15x64xf32>
    %61 = arith.select %59, %37, %60 : vector<2x15x64xi1>, vector<2x15x64xf32>
    %cst_20 = arith.constant dense<0.000000e+00> : vector<2x64xf32>
    %62 = vector.multi_reduction <add>, %61, %cst_20 [1] : vector<2x15x64xf32> to vector<2x64xf32>
    %cst_21 = arith.constant 2.500000e-01 : f32
    %63 = vector.broadcast %cst_21 : f32 to vector<2x64xf32>
    %64 = arith.mulf %62, %63 : vector<2x64xf32>
    %65 = arith.truncf %64 : vector<2x64xf32> to vector<2x64xbf16>
    %c0_22 = arith.constant 0 : index
    %c0_23 = arith.constant 0 : index
    %66 = vector.load %arg6[%c0_22, %c0_23] : memref<64x64xbf16, #tpu.memory_space<vmem>>, vector<64x64xbf16>
    %cst_24 = arith.constant dense<0.000000e+00> : vector<2x64xf32>
    %67 = tpu.matmul %65, %66, %cst_24 {dimension_numbers = #tpu.dot_dimension_numbers<[1], [0], [0], [1], [0, 0, 1, 1], [], []>} : vector<2x64xbf16>, vector<64x64xbf16>, vector<2x64xf32> -> vector<2x64xf32>
    %c0_25 = arith.constant 0 : index
    %c0_26 = arith.constant 0 : index
    %68 = vector.load %arg7[%c0_25, %c0_26] : memref<1x64xf32, #tpu.memory_space<vmem>>, vector<1x64xf32>
    %69 = vector.broadcast %68 : vector<1x64xf32> to vector<2x64xf32>
    %70 = arith.addf %67, %69 : vector<2x64xf32>
    %cst_27 = arith.constant 0.000000e+00 : f32
    %71 = vector.broadcast %cst_27 : f32 to vector<2x64xf32>
    %72 = arith.maximumf %70, %71 : vector<2x64xf32>
    %73 = arith.truncf %72 : vector<2x64xf32> to vector<2x64xbf16>
    %c0_28 = arith.constant 0 : index
    %c0_29 = arith.constant 0 : index
    %74 = vector.load %arg8[%c0_28, %c0_29] : memref<64x64xbf16, #tpu.memory_space<vmem>>, vector<64x64xbf16>
    %cst_30 = arith.constant dense<0.000000e+00> : vector<2x64xf32>
    %75 = tpu.matmul %73, %74, %cst_30 {dimension_numbers = #tpu.dot_dimension_numbers<[1], [0], [0], [1], [0, 0, 1, 1], [], []>} : vector<2x64xbf16>, vector<64x64xbf16>, vector<2x64xf32> -> vector<2x64xf32>
    %c0_31 = arith.constant 0 : index
    %c0_32 = arith.constant 0 : index
    %76 = vector.load %arg9[%c0_31, %c0_32] : memref<1x64xf32, #tpu.memory_space<vmem>>, vector<1x64xf32>
    %77 = vector.broadcast %76 : vector<1x64xf32> to vector<2x64xf32>
    %78 = arith.addf %75, %77 : vector<2x64xf32>
    %79 = tpu.concatenate %64, %78 in 1 : vector<2x64xf32>, vector<2x64xf32> -> vector<2x128xf32>
    %c0_33 = arith.constant 0 : index
    %c0_34 = arith.constant 0 : index
    %80 = vector.load %arg10[%c0_33, %c0_34] : memref<2x128xf32, #tpu.memory_space<vmem>>, vector<2x128xf32>
    tpu.vector_store %arg10[%c0_33, %c0_34], %79 {strides = array<i32>} : memref<2x128xf32, #tpu.memory_space<vmem>>, vector<2x128xf32>,
    return
  }
  func.func @transform_0(%arg0: i32) -> (i32, i32, i32) {
    %c0_i32 = arith.constant 0 : i32
    %c0_i32_0 = arith.constant 0 : i32
    %c0_i32_1 = arith.constant 0 : i32
    return %arg0, %c0_i32, %c0_i32_0 : i32, i32, i32
  }
  func.func @transform_1(%arg0: i32) -> (i32, i32) {
    %c0_i32 = arith.constant 0 : i32
    %c0_i32_0 = arith.constant 0 : i32
    %c0_i32_1 = arith.constant 0 : i32
    return %c0_i32, %c0_i32_0 : i32, i32
  }
  func.func @transform_2(%arg0: i32) -> (i32, i32) {
    %c0_i32 = arith.constant 0 : i32
    %c0_i32_0 = arith.constant 0 : i32
    %c0_i32_1 = arith.constant 0 : i32
    return %c0_i32, %c0_i32_0 : i32, i32
  }
  func.func @transform_3(%arg0: i32) -> (i32, i32) {
    %c0_i32 = arith.constant 0 : i32
    %c0_i32_0 = arith.constant 0 : i32
    %c0_i32_1 = arith.constant 0 : i32
    return %c0_i32, %c0_i32_0 : i32, i32
  }
  func.func @transform_4(%arg0: i32) -> (i32, i32) {
    %c0_i32 = arith.constant 0 : i32
    %c0_i32_0 = arith.constant 0 : i32
    %c0_i32_1 = arith.constant 0 : i32
    return %c0_i32, %c0_i32_0 : i32, i32
  }
  func.func @transform_5(%arg0: i32) -> (i32, i32) {
    %c0_i32 = arith.constant 0 : i32
    %c0_i32_0 = arith.constant 0 : i32
    %c0_i32_1 = arith.constant 0 : i32
    return %c0_i32, %c0_i32_0 : i32, i32
  }
  func.func @transform_6(%arg0: i32) -> (i32, i32) {
    %c0_i32 = arith.constant 0 : i32
    %c0_i32_0 = arith.constant 0 : i32
    %c0_i32_1 = arith.constant 0 : i32
    return %c0_i32, %c0_i32_0 : i32, i32
  }
  func.func @transform_7(%arg0: i32) -> (i32, i32) {
    %c0_i32 = arith.constant 0 : i32
    %c0_i32_0 = arith.constant 0 : i32
    %c0_i32_1 = arith.constant 0 : i32
    return %c0_i32, %c0_i32_0 : i32, i32
  }
  func.func @transform_8(%arg0: i32) -> (i32, i32) {
    %c0_i32 = arith.constant 0 : i32
    %c0_i32_0 = arith.constant 0 : i32
    %c0_i32_1 = arith.constant 0 : i32
    return %c0_i32, %c0_i32_0 : i32, i32
  }
  func.func @transform_9(%arg0: i32) -> (i32, i32) {
    %c0_i32 = arith.constant 0 : i32
    %c0_i32_0 = arith.constant 0 : i32
    return %arg0, %c0_i32 : i32, i32
  }
}

</mosaic_0001>

<bundles_post_ra>
// kernel: simclr_forward.1
= control target key start
LH: loop header
LB: loop body
LE: loop exit
PB: predicated region body
PF: predicated region fallthrough
CT: control target
= control target key end

     0   :  { %vm90_vm0 = vcmask 588800   ;;  %vm97_vm1 = vcmask 1043456   ;;  %vm162_vm2 = vcmask 1041408   ;;  %vm168_vm3 = vcmask 1045504   ;;  %s920_s10 = smov 64   ;;  %s921_s11 = smov 32   ;;  %s1176_s1 = inlined_call_operand.vmem [shape: bf16[72,32], index: 1, kind: input, shape index: {}]   ;;  %s1177_s0 = inlined_call_operand.vmem [shape: bf16[2,16,72], index: 0, kind: input, shape index: {}]   ;;  %s1178_s3 = inlined_call_operand.vmem [shape: bf16[256,64], index: 3, kind: input, shape index: {}]   ;;  %s1179_s2 = inlined_call_operand.vmem [shape: f32[1,32], index: 2, kind: input, shape index: {}]   ;;  %s1180_s5 = inlined_call_operand.vmem [shape: bf16[64,64], index: 5, kind: input, shape index: {}]   ;;  %s1181_s7 = inlined_call_operand.vmem [shape: bf16[64,64], index: 7, kind: input, shape index: {}]   ;;  %s1182_s4 = inlined_call_operand.vmem [shape: f32[1,64], index: 4, kind: input, shape index: {}]   ;;  %s1183_s6 = inlined_call_operand.vmem [shape: f32[1,64], index: 6, kind: input, shape index: {}]   ;;  %s1184_s8 = inlined_call_operand.vmem [shape: f32[1,64], index: 8, kind: input, shape index: {}]   ;;  %s1185_s9 = inlined_call_operand.vmem [shape: f32[2,128], index: 9, kind: output, shape index: {}]  }
   0x1   :  { %v888_v0 = vld [vmem:[%s1176_s1] sm:$0xff]   ;;  %v889_v1 = vld [vmem:[%s1176_s1 + $0x8] sm:$0xff]   ;;  %v890_v2 = vld [vmem:[%s1176_s1 + $0x10] sm:$0xff]   ;;  %v919_v40 = vmov 0   ;;  %vm246_vm4 = vcmask 1044480   ;;  %vm196_vm6 = vcmask 1046528  }
   0x2   :  { %843 = vmatprep.subr.bf16.mxu0 %v888_v0  ;;  %v893_v3 = vld [vmem:[%s1177_s0] sm:$0xff]   ;;  %v891_v4 = vld [vmem:[%s1176_s1 + $0x18] sm:$0xff]   ;;  %v894_v7 = vld [vmem:[%s1177_s0 + $0x8] sm:$0xff]   ;;  %v1035_v41 = vrot.slane %v919_v40, 3  ;;  %v1040_v44 = vrot.slane %v919_v40, 2  ;;  %v1042_v45 = vrot.slane %v919_v40, 1 }
   0x3   :  { %844 = vmatpush3.bf16.msra.mxu0 %v888_v0  ;;  %853 = vmatprep.mubr.msk.bf16.mxu0 %vm90_vm0, %v893_v3  ;;  %v892_v5 = vld [vmem:[%s1176_s1 + $0x20] ss:$0 sps:$4 sm:$0xff]   ;;  %v897_v10 = vld [vmem:[%s1178_s3 + $0x48] sm:$0xff]   ;;  %v899_v12 = vld [vmem:[%s1178_s3 + $0x50] sm:$0xff]   ;;  %vm230_vm5 = vsmask.f32 5376 }
   0x4   :  { %845 = vmatprep.subr.bf16.mxu0 %v889_v1  ;;  %v99_v6 = vsel %vm97_vm1, %v892_v5, 0  ;;  %v895_v8 = vld [vmem:[%s1178_s3 + $0x40] sm:$0xff]   ;;  %v898_v11 = vld [vmem:[%s1178_s3 + $0x8] sm:$0xff]   ;;  %v900_v13 = vld [vmem:[%s1178_s3 + $0x10] sm:$0xff]   ;;  %v236_v54 = vor.u32 %v1035_v41, %v1040_v44  ;;  %vm171_vm7 = vsmask.f32 7424 }
   0x5   :  { %v896_v9 = vld [vmem:[%s1178_s3] sm:$0xff]   ;;  %805 = vmatprep.subr.bf16.mxu1 %v895_v8  ;;  %v901_v14 = vld [vmem:[%s1178_s3 + $0x58] sm:$0xff]   ;;  %v905_v34 = vld [vmem:[%s1178_s3 + $0x68] sm:$0xff]   ;;  %v261_v8 = vrot.slane %v919_v40, 4  ;;  %vm206_vm8 = vsmask.f32 6400 }
   0x6   :  { %806 = vmatpush3.bf16.msra.mxu1 %v896_v9  ;;  %v902_v15 = vld [vmem:[%s1178_s3 + $0x18] sm:$0xff]   ;;  %v759_v16 = vld [vmem:[%s1179_s2] ss:$0 sm:$0xff]  ;;  %v906_v35 = vld [vmem:[%s1178_s3 + $0x28] sm:$0xff]   ;;  %vm256_vm9 = vsmask.f32 4352 }
   0x7   :  { %846 = vmatpush3.bf16.msra.mxu0 %v889_v1  ;;  %807 = vmatprep.subr.bf16.mxu1 %v897_v10  ;;  %v903_v27 = vld [vmem:[%s1178_s3 + $0x60] sm:$0xff]   ;;  %v907_v46 = vld [vmem:[%s1178_s3 + $0x70] sm:$0xff]   ;;  %v909_v58 = vld [vmem:[%s1178_s3 + $0x78] sm:$0xff]   ;;  %vm272_vm10 = vcmask 261120   ;;  %vm277_vm11 = vcmask 523264   ;;  %vm282_vm12 = vcmask 785408  }
   0x8   :  { %847 = vmatprep.subr.bf16.mxu0 %v890_v2  ;;  %v904_v28 = vld [vmem:[%s1178_s3 + $0x20] sm:$0xff]   ;;  %v908_v47 = vld [vmem:[%s1178_s3 + $0x30] sm:$0xff]   ;;  %v910_v59 = vld [vmem:[%s1178_s3 + $0x38] sm:$0xff]   ;;  %s922_s3 = smov 96   ;;  %vm924_vm13 = vmmov 0   ;;  %vm591_vm15 = vcmask 1041409  }
   0xa   :  { %808 = vmatpush3.bf16.msra.mxu1 %v898_v11 }
   0xb   :  { %848 = vmatpush3.bf16.msra.mxu0 %v890_v2  ;;  %809 = vmatprep.subr.bf16.mxu1 %v899_v12 }
   0xc   :  { %849 = vmatprep.subr.bf16.mxu0 %v891_v4 }
   0xe   :  { %810 = vmatpush3.bf16.msra.mxu1 %v900_v13 }
   0xf   :  { %850 = vmatpush3.bf16.msra.mxu0 %v891_v4  ;;  %811 = vmatprep.subr.bf16.mxu1 %v901_v14 }
  0x10   :  { %881 = vmatprep.subr.msk.bf16.mxu0 %vm97_vm1, %v892_v5 }
  0x12   :  { %812 = vmatpush3.bf16.msra.mxu1 %v902_v15  ;;  %v214_v15 = vor.u32 %v1040_v44, %v1042_v45 }
  0x13   :  { %852 = vmatpush3.bf16.msra.mxu0 %v99_v6  ;;  %813 = vmatprep.subr.bf16.mxu1 %v903_v27 }
  0x16   :  { %854 = vmatmul.mubr.msk.bf16.vlgmr.msra.gmra.mrb[0].mxu0 %vm90_vm0, %v894_v7  ;;  %814 = vmatpush3.bf16.msra.mxu1 %v904_v28 }
  0x17   :  { %815 = vmatprep.subr.bf16.mxu1 %v905_v34 }
  0x1a   :  { %816 = vmatpush3.bf16.msra.mxu1 %v906_v35 }
  0x1b   :  { %817 = vmatprep.subr.bf16.mxu1 %v907_v46 }
  0x1e   :  { %818 = vmatpush3.bf16.msra.mxu1 %v908_v47 }
  0x1f   :  { %819 = vmatprep.subr.bf16.mxu1 %v909_v58 }
  0x22   :  { %820 = vmatpush3.bf16.msra.mxu1 %v910_v59 }
  0xe9   :  { %v855_v17 = vpop.f32.mrb[0].mxu0 }
  0xea   :  { %v144_v18 = vadd.f32 %v855_v17, %v759_v16  ;;  %v135_v19 = vpop.f32.mrb[1].mxu0 }
  0xeb   :  { %v136_v20 = vadd.f32 %v759_v16, %v135_v19  ;;  %v856_v21 = vpop.f32.mrb[2].mxu0 }
  0xec   :  { %v147_v22 = vadd.f32 %v856_v21, %v759_v16  ;;  %v138_v23 = vpop.f32.mrb[3].mxu0  ;;  %v152_v25 = vmax.f32 %v144_v18, 0.0  ;;  %v262_v18 = vor.u32 %v261_v8, %v1035_v41 }
  0xed   :  { %v139_v24 = vadd.f32 %v759_v16, %v138_v23  ;;  %v150_v29 = vmax.f32 %v136_v20, 0.0 }
  0xee   :  { %v153_v26 = vmax.f32 %v147_v22, 0.0 }
  0xef   :  { %v151_v30 = vmax.f32 %v139_v24, 0.0 }
  0xf0   :  { %v155_v31 = vmax.f32 %v152_v25, %v153_v26 }
  0xf1   :  { %v154_v32 = vmax.f32 %v150_v29, %v151_v30 }
  0xf2   :  { %v157_v33 = vpack.c.bf16 %v155_v31, %v155_v31 }
  0xf3   :  { %v156_v36 = vpack.c.bf16 %v154_v32, %v154_v32 }
  0xf4   :  { %v161_v37 = vrot.slane %v157_v33, 6 }
  0xf5   :  { %v160_v38 = vrot.slane %v156_v36, 6 }
  0xf6   :  { %v167_v39 = vsel %vm162_vm2, 0, %v161_v37 }
  0xf7   :  { %v1038_v42 = vsel %vm168_vm3, %v167_v39, 0  ;;  %v165_v43 = vsel %vm162_vm2, 0, %v160_v38 }
  0xf8   :  { %v1051_v48 = vsel %vm168_vm3, %v165_v43, 0  ;;  %v1054_v49 = vshrl.u32 %v1038_v42, 16  ;;  %v1057_v50 = vshll.u32 %v1038_v42, 16  ;;  %v200_v20 = vrot.slane %v1038_v42, 1 }
  0xf9   :  { %v172_v51 = vshrl.u32 %v1051_v48, 16  ;;  %v174_v52 = vshll.u32 %v1051_v48, 16  ;;  %v247_v53 = vrot.slane %v1051_v48, 3  ;;  %v197_v57 = vrot.slane %v1051_v48, 1 }
  0xfa   :  { %v238_v55 = vrot.slane %v1054_v49, 2  ;;  %v239_v56 = vrot.slane %v1057_v50, 3  ;;  %v186_v63 = vrot.slane %v1057_v50, 1  ;;  %v216_v21 = vrot.slane %v1054_v49, 1 }
  0xfb   :  { %v249_v60 = vsel %vm246_vm4, %v247_v53, %v1035_v41  ;;  %v231_v61 = vrot.slane %v172_v51, 2  ;;  %v232_v62 = vrot.slane %v174_v52, 3  ;;  %v176_v3 = vrot.slane %v174_v52, 1 }
  0xfc   :  { %252 = vrot.lane.b32.xlu1 %v249_v60, %s920_s10  ;;  %v240_v0 = vor.u32 %v239_v56, %v238_v55  ;;  %v199_v4 = vsel %vm196_vm6, %v197_v57, %v1042_v45  ;;  %v187_v5 = vor.u32 %v186_v63, %v1054_v49  ;;  %v207_v6 = vrot.slane %v172_v51, 1 }
  0xfd   :  { %v233_v2 = vor.u32 %v232_v62, %v231_v61  ;;  %v208_v7 = vrot.slane %v174_v52, 2  ;;  %v177_v10 = vor.u32 %v176_v3, %v172_v51  ;;  %v257_v11 = vrot.slane %v172_v51, 3  ;;  %v916_v3 = vld [vmem:[%s1181_s7 + $0x8] sm:$0xff]  }
  0xfe   :  { %v241_v1 = vsel %vm230_vm5, %v240_v0, %v236_v54  ;;  %v258_v12 = vrot.slane %v174_v52, 4  ;;  %v188_v13 = vsel %vm171_vm7, %v187_v5, %v1042_v45  ;;  %v217_v22 = vrot.slane %v1057_v50, 2  ;;  %v913_v0 = vld [vmem:[%s1180_s5 + $0x10] sm:$0xff]  }
  0xff   :  { %244 = vrot.lane.b32.xlu0 %v241_v1, %s921_s11  ;;  %v237_v9 = vsel %vm230_vm5, %v233_v2, %v236_v54  ;;  %v209_v14 = vor.u32 %v208_v7, %v207_v6  ;;  %v181_v16 = vsel %vm171_vm7, %v177_v10, %v1042_v45  ;;  %v250_v24 = vrot.slane %v1038_v42, 3  ;;  %v915_v1 = vld [vmem:[%s1181_s7] sm:$0xff]   ;;  %v914_v2 = vld [vmem:[%s1180_s5 + $0x18] sm:$0xff]  }
 0x100   :  { %202 = vrot.lane.b32.xlu1 %v199_v4, %s920_s10  ;;  %v259_v17 = vor.u32 %v258_v12, %v257_v11  ;;  %v264_v25 = vrot.slane %v1054_v49, 3  ;;  %v265_v26 = vrot.slane %v1057_v50, 4  ;;  %v201_v27 = vsel %vm196_vm6, %v200_v20, %v1042_v45  ;;  %v917_v4 = vld [vmem:[%s1181_s7 + $0x10] sm:$0xff]   ;;  %v769_v7 = vld [vmem:[%s1182_s4] ss:$0 sm:$0xff] }
 0x101   :  { %v215_v19 = vsel %vm206_vm8, %v209_v14, %v214_v15  ;;  %v218_v28 = vor.u32 %v217_v22, %v216_v21  ;;  %v251_v29 = vsel %vm246_vm4, %v250_v24, %v1035_v41  ;;  %v225_v36 = vrot.slane %v1051_v48, 2 }
 0x102   :  { %v263_v23 = vsel %vm256_vm9, %v259_v17, %v262_v18  ;;  %v266_v30 = vor.u32 %v265_v26, %v264_v25  ;;  %v228_v52 = vrot.slane %v1038_v42, 2  ;;  %v923_v63 = vmov 0.0  }
 0x103   :  { %242 = vrot.lane.b32.xlu0 %v237_v9, %s921_s11  ;;  %v219_v31 = vsel %vm206_vm8, %v218_v28, %v214_v15  ;;  %v227_v39 = vsel %vm168_vm3, %v225_v36, %v1040_v44  ;;  %857 = vmatprep.subr.bf16.mxu0 %v923_v63  ;;  %v512_v6 = vlaneseq }
 0x104   :  { %191 = vrot.lane.b32.xlu1 %v188_v13, %s921_s11  ;;  %v267_v32 = vsel %vm256_vm9, %v266_v30, %v262_v18  ;;  %865 = vmatprep.mubr.msk.bf16.mxu0 %vm924_vm13, %v923_v63 }
 0x105   :  { %869 = vmatprep.subr.bf16.mxu1 %v923_v63  ;;  %v513_v14 = vshrl.u32 %v512_v6, 7 }
 0x107   :  { %189 = vrot.lane.b32.xlu0 %v181_v16, %s921_s11  ;;  %v519_v18 = vand.u32 1, %v513_v14 }
 0x108   :  { %220 = vrot.lane.b32.xlu1 %v215_v19, %s922_s3 }
 0x109   :  { %vm1149_vm14 = vcmp.eq.s32.totalorder %v519_v18, 0 }
 0x10b   :  { %268 = vrot.lane.b32.xlu0 %v263_v23, %s922_s3 }
 0x10c   :  { %204 = vrot.lane.b32.xlu1 %v201_v27, %s920_s10 }
 0x10f   :  { %254 = vrot.lane.b32.xlu0 %v251_v29, %s920_s10 }
 0x110   :  { %222 = vrot.lane.b32.xlu1 %v219_v31, %s922_s3 }
 0x113   :  { %270 = vrot.lane.b32.xlu0 %v267_v32, %s922_s3 }
 0x16e   :  { %v253_v33 = vpop.permute.xlu1 %252 }
 0x171   :  { %v245_v34 = vpop.permute.xlu0 %244 }
 0x172   :  { %v203_v35 = vpop.permute.xlu1 %202 }
 0x175   :  { %v243_v37 = vpop.permute.xlu0 %242 }
 0x176   :  { %v192_v38 = vpop.permute.xlu1 %191  ;;  %v291_v41 = vsel %vm272_vm10, %v227_v39, %v243_v37 }
 0x177   :  { %v296_v49 = vsel %vm277_vm11, %v291_v41, %v253_v33  ;;  %v276_v57 = vsel %vm272_vm10, %v1038_v42, %v192_v38  ;;  %v912_v42 = vld [vmem:[%s1180_s5 + $0x8] sm:$0xff]  }
 0x179   :  { %v190_v40 = vpop.permute.xlu0 %189 }
 0x17a   :  { %v274_v43 = vsel %vm272_vm10, %v1051_v48, %v190_v40  ;;  %v221_v45 = vpop.permute.xlu1 %220  ;;  %v229_v48 = vsel %vm168_vm3, %v228_v52, %v1040_v44  ;;  %v911_v44 = vld [vmem:[%s1180_s5] sm:$0xff]  }
 0x17b   :  { %v279_v46 = vsel %vm277_vm11, %v274_v43, %v203_v35  ;;  %v294_v55 = vsel %vm272_vm10, %v229_v48, %v245_v34  ;;  %858 = vmatpush3.bf16.msra.mxu0 %v911_v44 }
 0x17c   :  { %v284_v53 = vsel %vm282_vm12, %v279_v46, %v221_v45  ;;  %859 = vmatprep.subr.bf16.mxu0 %v923_v63 }
 0x17d   :  { %v269_v47 = vpop.permute.xlu0 %268 }
 0x17e   :  { %v205_v50 = vpop.permute.xlu1 %204  ;;  %v300_v51 = vsel %vm282_vm12, %v296_v49, %v269_v47 }
 0x17f   :  { %472 = vmatprep.mubr.bf16.mxu1 %v300_v51  ;;  %v281_v60 = vsel %vm277_vm11, %v276_v57, %v205_v50  ;;  %860 = vmatpush3.bf16.msra.mxu0 %v912_v42  ;;  %v918_v42 = vld [vmem:[%s1181_s7 + $0x18] sm:$0xff]  }
 0x180   :  { %473 = vmatmul.mubr.bf16.vlgmr.msra.gmra.mrb[0].mxu1 %v284_v53  ;;  %861 = vmatprep.subr.bf16.mxu0 %v923_v63 }
 0x181   :  { %v255_v54 = vpop.permute.xlu0 %254  ;;  %870 = vmatpush3.bf16.msra.mxu1 %v915_v1 }
 0x182   :  { %v223_v56 = vpop.permute.xlu1 %222  ;;  %v298_v58 = vsel %vm277_vm11, %v294_v55, %v255_v54  ;;  %871 = vmatprep.subr.bf16.mxu1 %v923_v63 }
 0x183   :  { %v287_v62 = vsel %vm282_vm12, %v281_v60, %v223_v56  ;;  %862 = vmatpush3.bf16.msra.mxu0 %v913_v0  ;;  %v786_v0 = vld [vmem:[%s1183_s6] ss:$0 sm:$0xff] }
 0x184   :  { %863 = vmatprep.subr.bf16.mxu0 %v923_v63 }
 0x185   :  { %v271_v59 = vpop.permute.xlu0 %270  ;;  %872 = vmatpush3.bf16.msra.mxu1 %v916_v3 }
 0x186   :  { %v303_v61 = vsel %vm282_vm12, %v298_v58, %v271_v59  ;;  %873 = vmatprep.subr.bf16.mxu1 %v923_v63 }
 0x187   :  { %480 = vmatprep.mubr.bf16.mxu1 %v303_v61  ;;  %864 = vmatpush3.bf16.msra.mxu0 %v914_v2 }
 0x188   :  { %481 = vmatmul.mubr.bf16.gmra.mrb[4].mxu1 %v287_v62 }
 0x189   :  { %877 = vmatprep.mubr.msk.bf16.mxu1 %vm924_vm13, %v923_v63  ;;  %874 = vmatpush3.bf16.msra.mxu1 %v917_v4 }
 0x18a   :  { %875 = vmatprep.subr.bf16.mxu1 %v923_v63 }
 0x18d   :  { %876 = vmatpush3.bf16.msra.mxu1 %v918_v42 }
 0x253   :  { %v821_v5 = vpop.f32.mrb[0].mxu1 }
 0x254   :  { %v822_v8 = vpop.f32.mrb[1].mxu1 }
 0x255   :  { %v823_v9 = vadd.f32 %v822_v8, %v821_v5  ;;  %v824_v10 = vpop.f32.mrb[2].mxu1  ;;  %v792_v8 = vld [vmem:[%s1184_s8] ss:$0 sm:$0xff] }
 0x256   :  { %v825_v11 = vpop.f32.mrb[3].mxu1 }
 0x257   :  { %v475_v12 = vadd.f32 %v823_v9, %v769_v7  ;;  %v826_v13 = vadd.f32 %v825_v11, %v824_v10 }
 0x259   :  { %v489_v15 = vmax.f32 %v475_v12, 0.0  ;;  %v478_v16 = vadd.f32 %v826_v13, %v769_v7 }
 0x25b   :  { %v490_v17 = vmax.f32 %v478_v16, 0.0  ;;  %v827_v19 = vpop.f32.mrb[4].mxu1  ;;  %v498_v21 = vrot.slane %v489_v15, 1 }
 0x25c   :  { %v828_v20 = vpop.f32.mrb[5].mxu1 }
 0x25d   :  { %v499_v22 = vrot.slane %v490_v17, 1  ;;  %v829_v23 = vadd.f32 %v828_v20, %v827_v19  ;;  %v830_v24 = vpop.f32.mrb[6].mxu1 }
 0x25e   :  { %v831_v25 = vpop.f32.mrb[7].mxu1 }
 0x25f   :  { %v500_v26 = vsel %vm196_vm6, %v498_v21, %v499_v22  ;;  %v483_v28 = vadd.f32 %v829_v23, %v769_v7  ;;  %v832_v29 = vadd.f32 %v831_v25, %v830_v24 }
 0x260   :  { %v508_v30 = vmax.f32 %v489_v15, %v500_v26 }
 0x261   :  { %v491_v31 = vmax.f32 %v483_v28, 0.0  ;;  %v486_v32 = vadd.f32 %v832_v29, %v769_v7 }
 0x262   :  { %v545_v33 = vsel %vm1149_vm14, %v508_v30, 0.0 }
 0x263   :  { %v549_v34 = vsel %vm277_vm11, %v545_v33, 0.0  ;;  %v492_v35 = vmax.f32 %v486_v32, 0.0  ;;  %v501_v37 = vrot.slane %v491_v31, 1 }
 0x264   :  { %v553_v36 = vrot.slane %v549_v34, 4 }
 0x265   :  { %v502_v38 = vrot.slane %v492_v35, 1 }
 0x266   :  { %v554_v39 = vadd.f32 %v553_v36, %v549_v34 }
 0x267   :  { %v503_v40 = vsel %vm196_vm6, %v501_v37, %v502_v38 }
 0x268   :  { %v555_v41 = vrot.slane %v554_v39, 2  ;;  %v510_v43 = vmax.f32 %v491_v31, %v503_v40 }
 0x26a   :  { %v556_v45 = vadd.f32 %v555_v41, %v554_v39  ;;  %v547_v46 = vsel %vm1149_vm14, %v510_v43, 0.0 }
 0x26b   :  { %v559_v47 = vsel %vm277_vm11, %v547_v46, 0.0 }
 0x26c   :  { %v557_v49 = vrot.slane %v556_v45, 1  ;;  %v562_v50 = vrot.slane %v559_v47, 4 }
 0x26e   :  { %v563_v51 = vadd.f32 %v562_v50, %v559_v47  ;;  %v558_v52 = vadd.f32 %v557_v49, %v556_v45 }
 0x270   :  { %v564_v53 = vrot.slane %v563_v51, 2  ;;  %v568_v48 = vmul.f32 0.25, %v558_v52 }
 0x272   :  { %v565_v54 = vadd.f32 %v564_v53, %v563_v51  ;;  %v570_v58 = vpack.c.bf16 %v568_v48, %v568_v48 }
 0x274   :  { %v566_v55 = vrot.slane %v565_v54, 1  ;;  %v589_v61 = vunpack.c.l.b16 %v570_v58 }
 0x276   :  { %v567_v56 = vadd.f32 %v566_v55, %v565_v54 }
 0x278   :  { %v569_v57 = vmul.f32 0.25, %v567_v56 }
 0x27a   :  { %v571_v59 = vpack.c.bf16 %v569_v57, %v569_v57  ;;  %v747_v60 = vsel %vm591_vm15, %v569_v57, %v568_v48 }
 0x27c   :  { %v590_v62 = vunpack.c.l.b16 %v571_v59 }
 0x27e   :  { %v592_v63 = vsel %vm591_vm15, %v590_v62, %v589_v61 }
 0x27f   :  { %v593_v44 = vpack.c.b16 %v592_v63, %v592_v63 }
 0x281   :  { %866 = vmatmul.mubr.msk.bf16.vlgmr.msra.gmra.mrb[4].mxu0 %vm277_vm11, %v593_v44 }
 0x354   :  { %v655_v1 = vpop.f32.mrb[4].mxu0 }
 0x355   :  { %v656_v2 = vadd.f32 %v786_v0, %v655_v1  ;;  %v867_v3 = vpop.f32.mrb[5].mxu0 }
 0x356   :  { %v658_v4 = vpop.f32.mrb[6].mxu0 }
 0x357   :  { %v661_v5 = vmax.f32 %v656_v2, 0.0  ;;  %v868_v6 = vpop.f32.mrb[7].mxu0 }
 0x359   :  { %v662_v7 = vpack.c.bf16 %v661_v5, %v661_v5 }
 0x35b   :  { %878 = vmatmul.mubr.msk.bf16.vlgmr.msra.gmra.mrb[8].mxu1 %vm277_vm11, %v662_v7 }
 0x42e   :  { %v739_v9 = vpop.f32.mrb[8].mxu1 }
 0x42f   :  { %v740_v10 = vadd.f32 %v792_v8, %v739_v9  ;;  %v879_v11 = vpop.f32.mrb[9].mxu1 }
 0x430   :  { %v742_v12 = vpop.f32.mrb[10].mxu1 }
 0x431   :  { %750 = vrot.lane.b32.xlu0 %v740_v10, %s920_s10  ;;  %v880_v13 = vpop.f32.mrb[11].mxu1 }
 0x4a3   :  { %v751_v14 = vpop.permute.xlu0 %750 }
 0x4a4   :  { %v753_v15 = vsel %vm277_vm11, %v747_v60, %v751_v14 }
 0x4a5   :  { %754 = vst [vmem:[%s1185_s9] sm:$0x3] %v753_v15 }

</bundles_post_ra>
